<compile_context>
chip_gen: v7x
topology: tpu7x:2x2x1
jax: 0.10.0
libtpu: 0.0.40
codegen_flags: <defaults>
</compile_context>

<pallas_src>
import math
import jax
import jax.numpy as jnp
from jax.experimental import pallas as pl
from jax.experimental.pallas import tpu as pltpu


def _round_up(x, m):
    return ((x + m - 1) // m) * m


def _vmem_capacity_bytes():
    """Physical per-core VMEM; conservative 64 MiB (v7x-sized) fallback."""
    try:
        return int(pltpu.get_tpu_info().vmem_capacity_bytes)
    except Exception:
        return 64 * 1024 * 1024


def _bq_cond_kernel(prev_ref, emb_ref, w1_ref, b1_ref, w2_ref, b2_ref, out_ref):
    # prev_ref: (TB, N)   emb_ref: (N, D)
    # w1_ref: (N, H)  b1_ref: (1, H)  w2_ref: (H, D)  b2_ref: (1, D)
    # out_ref: (TB, N, D)
    prev = prev_ref[...]                                               # (TB, N)
    h = jnp.dot(prev, w1_ref[...], preferred_element_type=jnp.float32)
    h = jnp.maximum(h + b1_ref[...], 0.0)                              # (TB, H)
    cond = jnp.dot(h, w2_ref[...], preferred_element_type=jnp.float32)
    cond = cond + b2_ref[...]                                          # (TB, D)
    # f32 broadcast-add (no bf16 VALU needed on v5e); cast only at the store.
    out_ref[...] = (emb_ref[...][None, :, :] + cond[:, None, :]).astype(out_ref.dtype)


def _bq_nocond_kernel(emb_ref, out_ref):
    # TODO(synk): on v7x a persistent-VMEM-scratch fill (pl.when(pid==0)) could
    # shave a few % here; skipped — DMA still dominates on v5e/v6e.
    out_ref[...] = jnp.broadcast_to(
        emb_ref[...][None, :, :], out_ref.shape).astype(out_ref.dtype)


def blendshape_query_embedding(params, batch_size, prev_blendshapes=None,
                               *, block_b=None, out_dtype=None):
    """Pallas forward of BlendshapeQueryEmbedding.  Returns (B, N, D)."""
    emb = params["query_embeddings"]          # (N, D)
    N, D = emb.shape
    out_dtype = jnp.dtype(out_dtype) if out_dtype is not None else jnp.dtype(emb.dtype)
    itemsize = out_dtype.itemsize

    vmem_cap = _vmem_capacity_bytes()
    row_bytes = N * D * itemsize              # one output row (one batch element)

    # --- batch tile sizing ---------------------------------------------------
    # Double-buffered output block capped at ~25% of physical VMEM.
    tb_from_vmem = max(8, ((vmem_cap // 4) // (2 * row_bytes)) // 8 * 8)
    tb_cap = min(block_b if block_b is not None else 512, tb_from_vmem)
    tb = _round_up(max(8, min(tb_cap, batch_size)), 8)
    # Force >= 2 grid steps for medium batches so v7x's 2 TensorCores both work.
    if batch_size >= 32 and pl.cdiv(batch_size, tb) == 1:
        tb = _round_up(pl.cdiv(batch_size, 2), 8)
    grid = (pl.cdiv(batch_size, tb),)

    # --- explicit scoped-VMEM limit (default would reject big tiles on v5e) --
    h_dim = params["w1"].shape[1] if "w1" in params else D // 2
    param_bytes = (N * D + N * h_dim + h_dim + h_dim * D + D) * 4
    buf_bytes = (2 * tb * row_bytes            # double-buffered output block
                 + 2 * tb * N * 4              # double-buffered prev tile
                 + 2 * param_bytes)            # params (worst case: double-buffered)
    vmem_limit = int(min(max(buf_bytes + (8 << 20), 32 << 20), (vmem_cap * 3) // 4))

    compiler_params = pltpu.CompilerParams(
        dimension_semantics=("parallel",),
        vmem_limit_bytes=vmem_limit)

    def param_spec(shape, single_buffer):
        # Block-invariant (constant index_map) parameter input.
        index_map = (lambda b: (0, 0))
        if single_buffer:
            return pl.BlockSpec(shape, index_map, pipeline_mode=pl.Buffered(1))
        return pl.BlockSpec(shape, index_map)

    # --- unconditioned path: tiled broadcast of the embedding table ----------
    if prev_blendshapes is None:
        cost = pl.CostEstimate(
            flops=0,
            transcendentals=0,
            bytes_accessed=int(batch_size * row_bytes + N * D * emb.dtype.itemsize))

        def run_nc(single_buffer_params):
            return pl.pallas_call(
                _bq_nocond_kernel,
                out_shape=jax.ShapeDtypeStruct((batch_size, N, D), out_dtype),
                grid_spec=pltpu.PrefetchScalarGridSpec(
                    num_scalar_prefetch=0,
                    grid=grid,
                    in_specs=[param_spec((N, D), single_buffer_params)],
                    out_specs=pl.BlockSpec((tb, N, D), lambda b: (b, 0, 0)),
                ),
                compiler_params=compiler_params,
                cost_estimate=cost,
            )(emb)

        try:
            return run_nc(True)
        except Exception:   # pipeline_mode=Buffered(1) unsupported -> plain specs
            return run_nc(False)

    # --- conditioned path -----------------------------------------------------
    w1 = params["w1"]            # (N, H)
    b1 = params["b1"]            # (1, H)
    w2 = params["w2"]            # (H, D)
    b2 = params["b2"]            # (1, D)
    H = w1.shape[1]

    prev = prev_blendshapes.astype(jnp.float32)   # (B, N); ragged tail tile is
    # read padded / garbage rows, but those rows' writes are masked by Pallas.

    cost = pl.CostEstimate(
        flops=int(2 * batch_size * (N * H + H * D)),
        transcendentals=0,
        bytes_accessed=int(
            batch_size * row_bytes                         # output writeback
            + batch_size * N * 4                           # prev rows
            + (N * D + N * H + H + H * D + D) * 4))        # table + MLP params

    def run_c(single_buffer_params):
        return pl.pallas_call(
            _bq_cond_kernel,
            out_shape=jax.ShapeDtypeStruct((batch_size, N, D), out_dtype),
            grid_spec=pltpu.PrefetchScalarGridSpec(
                num_scalar_prefetch=0,
                grid=grid,
                in_specs=[
                    pl.BlockSpec((tb, N), lambda b: (b, 0)),          # prev tile
                    param_spec((N, D), single_buffer_params),         # emb table
                    param_spec((N, H), single_buffer_params),         # MLP W1
                    param_spec((1, H), single_buffer_params),         # MLP b1
                    param_spec((H, D), single_buffer_params),         # MLP W2
                    param_spec((1, D), single_buffer_params),         # MLP b2
                ],
                out_specs=pl.BlockSpec((tb, N, D), lambda b: (b, 0, 0)),
            ),
            compiler_params=compiler_params,
            cost_estimate=cost,
        )(prev, emb, w1, b1, w2, b2)

    try:
        return run_c(True)
    except Exception:       # pipeline_mode=Buffered(1) unsupported -> plain specs
        return run_c(False)


def init_params(key, num_blendshapes=52, d_query=128):
    """Deterministic parameter init mirroring the PyTorch module's shapes."""
    k_emb, k_w1, k_b1, k_w2, k_b2 = jax.random.split(key, 5)
    H = d_query // 2

    # nn.init.xavier_uniform_ on (num_blendshapes, d_query)
    bound_emb = math.sqrt(6.0 / (num_blendshapes + d_query))
    emb = jax.random.uniform(k_emb, (num_blendshapes, d_query),
                             jnp.float32, -bound_emb, bound_emb)

    # Linear(num_blendshapes -> H): PyTorch default init bounds.
    bw1 = 1.0 / math.sqrt(num_blendshapes)
    w1 = jax.random.uniform(k_w1, (num_blendshapes, H), jnp.float32, -bw1, bw1)
    b1 = jax.random.uniform(k_b1, (1, H), jnp.float32, -bw1, bw1)

    # Linear(H -> d_query)
    bw2 = 1.0 / math.sqrt(H)
    w2 = jax.random.uniform(k_w2, (H, d_query), jnp.float32, -bw2, bw2)
    b2 = jax.random.uniform(k_b2, (1, d_query), jnp.float32, -bw2, bw2)

    return {"query_embeddings": emb, "w1": w1, "b1": b1, "w2": w2, "b2": b2}


def _reference(params, batch_size, prev):
    emb = params["query_embeddings"]
    queries = jnp.broadcast_to(emb[None], (batch_size,) + emb.shape)
    if prev is not None:
        h = jnp.maximum(prev @ params["w1"] + params["b1"], 0.0)
        cond = h @ params["w2"] + params["b2"]           # (B, D)
        queries = queries + cond[:, None, :]
    return queries


if __name__ == "__main__":
    key = jax.random.PRNGKey(0)
    k_params, k_prev, k_prev_big = jax.random.split(key, 3)

    NUM_BLENDSHAPES = 52
    D_QUERY = 128
    BATCH = 2

    params = init_params(k_params, NUM_BLENDSHAPES, D_QUERY)
    prev_blendshapes = jax.random.uniform(
        k_prev, (BATCH, NUM_BLENDSHAPES), jnp.float32)   # previous BS state in [0,1)

    # Conditioned path (hot path: batched MLP matmuls + broadcast-add per tile).
    out = blendshape_query_embedding(params, BATCH, prev_blendshapes)
    out = jax.block_until_ready(out)

    # Unconditioned path (tiled broadcast of the embedding table).
    out_nc = blendshape_query_embedding(params, BATCH, None)
    out_nc = jax.block_until_ready(out_nc)

    # Ragged, multi-step batch: grid = 2 (TB = 104), tail block masked on write.
    BATCH_BIG = 200
    prev_big = jax.random.uniform(
        k_prev_big, (BATCH_BIG, NUM_BLENDSHAPES), jnp.float32)
    out_big = blendshape_query_embedding(params, BATCH_BIG, prev_big)
    out_big = jax.block_until_ready(out_big)

    # Optional half-HBM-traffic output path: f32 compute, bf16 store.
    out_bf16 = blendshape_query_embedding(params, BATCH_BIG, prev_big,
                                          out_dtype=jnp.bfloat16)
    out_bf16 = jax.block_until_ready(out_bf16)

    # Correctness checks against a pure-JAX reference.
    ref = _reference(params, BATCH, prev_blendshapes)
    ref_nc = _reference(params, BATCH, None)
    ref_big = _reference(params, BATCH_BIG, prev_big)
    assert out.shape == (BATCH, NUM_BLENDSHAPES, D_QUERY)
    assert out_big.shape == (BATCH_BIG, NUM_BLENDSHAPES, D_QUERY)
    assert out_bf16.dtype == jnp.bfloat16
    assert jnp.allclose(out, ref, atol=1e-5, rtol=1e-5)
    assert jnp.allclose(out_nc, ref_nc, atol=1e-5, rtol=1e-5)
    assert jnp.allclose(out_big, ref_big, atol=1e-5, rtol=1e-5)
    assert jnp.allclose(out_bf16.astype(jnp.float32), ref_big, atol=2e-2, rtol=2e-2)

    print("KERNEL_OK")
</pallas_src>

<mosaic_0001>
module attributes {stable_mosaic.version = 11 : i64} {
  func.func @_bq_cond_kernel(%arg0: i32, %arg1: memref<8x52xf32, #tpu.memory_space<vmem>>, %arg2: memref<52x128xf32, #tpu.memory_space<vmem>>, %arg3: memref<52x64xf32, #tpu.memory_space<vmem>>, %arg4: memref<1x64xf32, #tpu.memory_space<vmem>>, %arg5: memref<64x128xf32, #tpu.memory_space<vmem>>, %arg6: memref<1x128xf32, #tpu.memory_space<vmem>>, %arg7: memref<8x52x128xf32, #tpu.memory_space<vmem>>) attributes {dimension_semantics = [#tpu.dimension_semantics<parallel>], iteration_bounds = array<i64: 1>, scalar_prefetch = 0 : i64, scratch_operands = 0 : i64, tpu.core_type = #tpu.core_type<tc>, window_params = [{transform_indices = @transform_0, window_bounds = array<i64: 8, 52>}, {pipeline_mode = #tpu.pipeline_mode<synchronous>, transform_indices = @transform_1, window_bounds = array<i64: 52, 128>}, {pipeline_mode = #tpu.pipeline_mode<synchronous>, transform_indices = @transform_2, window_bounds = array<i64: 52, 64>}, {pipeline_mode = #tpu.pipeline_mode<synchronous>, transform_indices = @transform_3, window_bounds = array<i64: 1, 64>}, {pipeline_mode = #tpu.pipeline_mode<synchronous>, transform_indices = @transform_4, window_bounds = array<i64: 64, 128>}, {pipeline_mode = #tpu.pipeline_mode<synchronous>, transform_indices = @transform_5, window_bounds = array<i64: 1, 128>}, {transform_indices = @transform_6, window_bounds = array<i64: 8, 52, 128>}]} {
    %c0 = arith.constant 0 : index
    %c0_0 = arith.constant 0 : index
    %0 = vector.load %arg1[%c0, %c0_0] : memref<8x52xf32, #tpu.memory_space<vmem>>, vector<8x52xf32>
    %c0_1 = arith.constant 0 : index
    %c0_2 = arith.constant 0 : index
    %1 = vector.load %arg3[%c0_1, %c0_2] : memref<52x64xf32, #tpu.memory_space<vmem>>, vector<52x64xf32>
    %cst = arith.constant dense<0.000000e+00> : vector<8x64xf32>
    %2 = tpu.matmul %0, %1, %cst {dimension_numbers = #tpu.dot_dimension_numbers<[1], [0], [0], [1], [0, 0, 1, 1], [], []>} : vector<8x52xf32>, vector<52x64xf32>, vector<8x64xf32> -> vector<8x64xf32>
    %c0_3 = arith.constant 0 : index
    %c0_4 = arith.constant 0 : index
    %3 = vector.load %arg4[%c0_3, %c0_4] : memref<1x64xf32, #tpu.memory_space<vmem>>, vector<1x64xf32>
    %4 = vector.broadcast %3 : vector<1x64xf32> to vector<8x64xf32>
    %5 = arith.addf %2, %4 : vector<8x64xf32>
    %cst_5 = arith.constant 0.000000e+00 : f32
    %6 = vector.broadcast %cst_5 : f32 to vector<8x64xf32>
    %7 = arith.maximumf %5, %6 : vector<8x64xf32>
    %c0_6 = arith.constant 0 : index
    %c0_7 = arith.constant 0 : index
    %8 = vector.load %arg5[%c0_6, %c0_7] : memref<64x128xf32, #tpu.memory_space<vmem>>, vector<64x128xf32>
    %cst_8 = arith.constant dense<0.000000e+00> : vector<8x128xf32>
    %9 = tpu.matmul %7, %8, %cst_8 {dimension_numbers = #tpu.dot_dimension_numbers<[1], [0], [0], [1], [0, 0, 1, 1], [], []>} : vector<8x64xf32>, vector<64x128xf32>, vector<8x128xf32> -> vector<8x128xf32>
    %c0_9 = arith.constant 0 : index
    %c0_10 = arith.constant 0 : index
    %10 = vector.load %arg6[%c0_9, %c0_10] : memref<1x128xf32, #tpu.memory_space<vmem>>, vector<1x128xf32>
    %11 = vector.broadcast %10 : vector<1x128xf32> to vector<8x128xf32>
    %12 = arith.addf %9, %11 : vector<8x128xf32>
    %c0_11 = arith.constant 0 : index
    %c0_12 = arith.constant 0 : index
    %13 = vector.load %arg2[%c0_11, %c0_12] : memref<52x128xf32, #tpu.memory_space<vmem>>, vector<52x128xf32>
    %14 = vector.shape_cast %13 : vector<52x128xf32> to vector<1x52x128xf32>
    %15 = vector.shape_cast %12 : vector<8x128xf32> to vector<8x1x128xf32>
    %16 = vector.broadcast %14 : vector<1x52x128xf32> to vector<8x52x128xf32>
    %17 = vector.broadcast %15 : vector<8x1x128xf32> to vector<8x52x128xf32>
    %18 = arith.addf %16, %17 : vector<8x52x128xf32>
    %c0_13 = arith.constant 0 : index
    %c0_14 = arith.constant 0 : index
    %c0_15 = arith.constant 0 : index
    %19 = vector.load %arg7[%c0_13, %c0_14, %c0_15] : memref<8x52x128xf32, #tpu.memory_space<vmem>>, vector<8x52x128xf32>
    tpu.vector_store %arg7[%c0_13, %c0_14, %c0_15], %18 {strides = array<i32>} : memref<8x52x128xf32, #tpu.memory_space<vmem>>, vector<8x52x128xf32>,
    return
  }
  func.func @transform_0(%arg0: i32) -> (i32, i32) {
    %c0_i32 = arith.constant 0 : i32
    %c0_i32_0 = arith.constant 0 : i32
    return %arg0, %c0_i32 : i32, i32
  }
  func.func @transform_1(%arg0: i32) -> (i32, i32) {
    %c0_i32 = arith.constant 0 : i32
    %c0_i32_0 = arith.constant 0 : i32
    %c0_i32_1 = arith.constant 0 : i32
    return %c0_i32, %c0_i32_0 : i32, i32
  }
  func.func @transform_2(%arg0: i32) -> (i32, i32) {
    %c0_i32 = arith.constant 0 : i32
    %c0_i32_0 = arith.constant 0 : i32
    %c0_i32_1 = arith.constant 0 : i32
    return %c0_i32, %c0_i32_0 : i32, i32
  }
  func.func @transform_3(%arg0: i32) -> (i32, i32) {
    %c0_i32 = arith.constant 0 : i32
    %c0_i32_0 = arith.constant 0 : i32
    %c0_i32_1 = arith.constant 0 : i32
    return %c0_i32, %c0_i32_0 : i32, i32
  }
  func.func @transform_4(%arg0: i32) -> (i32, i32) {
    %c0_i32 = arith.constant 0 : i32
    %c0_i32_0 = arith.constant 0 : i32
    %c0_i32_1 = arith.constant 0 : i32
    return %c0_i32, %c0_i32_0 : i32, i32
  }
  func.func @transform_5(%arg0: i32) -> (i32, i32) {
    %c0_i32 = arith.constant 0 : i32
    %c0_i32_0 = arith.constant 0 : i32
    %c0_i32_1 = arith.constant 0 : i32
    return %c0_i32, %c0_i32_0 : i32, i32
  }
  func.func @transform_6(%arg0: i32) -> (i32, i32, i32) {
    %c0_i32 = arith.constant 0 : i32
    %c0_i32_0 = arith.constant 0 : i32
    %c0_i32_1 = arith.constant 0 : i32
    return %arg0, %c0_i32, %c0_i32_0 : i32, i32, i32
  }
}

module attributes {stable_mosaic.version = 11 : i64} {
  func.func @_bq_cond_kernel(%arg0: i32, %arg1: memref<8x52xf32, #tpu.memory_space<vmem>>, %arg2: memref<52x128xf32, #tpu.memory_space<vmem>>, %arg3: memref<52x64xf32, #tpu.memory_space<vmem>>, %arg4: memref<1x64xf32, #tpu.memory_space<vmem>>, %arg5: memref<64x128xf32, #tpu.memory_space<vmem>>, %arg6: memref<1x128xf32, #tpu.memory_space<vmem>>, %arg7: memref<8x52x128xf32, #tpu.memory_space<vmem>>) attributes {dimension_semantics = [#tpu.dimension_semantics<parallel>], iteration_bounds = array<i64: 1>, scalar_prefetch = 0 : i64, scratch_operands = 0 : i64, tpu.core_type = #tpu.core_type<tc>, window_params = [{transform_indices = @transform_0, window_bounds = array<i64: 8, 52>}, {pipeline_mode = #tpu.pipeline_mode<synchronous>, transform_indices = @transform_1, window_bounds = array<i64: 52, 128>}, {pipeline_mode = #tpu.pipeline_mode<synchronous>, transform_indices = @transform_2, window_bounds = array<i64: 52, 64>}, {pipeline_mode = #tpu.pipeline_mode<synchronous>, transform_indices = @transform_3, window_bounds = array<i64: 1, 64>}, {pipeline_mode = #tpu.pipeline_mode<synchronous>, transform_indices = @transform_4, window_bounds = array<i64: 64, 128>}, {pipeline_mode = #tpu.pipeline_mode<synchronous>, transform_indices = @transform_5, window_bounds = array<i64: 1, 128>}, {transform_indices = @transform_6, window_bounds = array<i64: 8, 52, 128>}]} {
    %c0 = arith.constant 0 : index
    %c0_0 = arith.constant 0 : index
    %0 = vector.load %arg1[%c0, %c0_0] : memref<8x52xf32, #tpu.memory_space<vmem>>, vector<8x52xf32>
    %c0_1 = arith.constant 0 : index
    %c0_2 = arith.constant 0 : index
    %1 = vector.load %arg3[%c0_1, %c0_2] : memref<52x64xf32, #tpu.memory_space<vmem>>, vector<52x64xf32>
    %cst = arith.constant dense<0.000000e+00> : vector<8x64xf32>
    %2 = tpu.matmul %0, %1, %cst {dimension_numbers = #tpu.dot_dimension_numbers<[1], [0], [0], [1], [0, 0, 1, 1], [], []>} : vector<8x52xf32>, vector<52x64xf32>, vector<8x64xf32> -> vector<8x64xf32>
    %c0_3 = arith.constant 0 : index
    %c0_4 = arith.constant 0 : index
    %3 = vector.load %arg4[%c0_3, %c0_4] : memref<1x64xf32, #tpu.memory_space<vmem>>, vector<1x64xf32>
    %4 = vector.broadcast %3 : vector<1x64xf32> to vector<8x64xf32>
    %5 = arith.addf %2, %4 : vector<8x64xf32>
    %cst_5 = arith.constant 0.000000e+00 : f32
    %6 = vector.broadcast %cst_5 : f32 to vector<8x64xf32>
    %7 = arith.maximumf %5, %6 : vector<8x64xf32>
    %c0_6 = arith.constant 0 : index
    %c0_7 = arith.constant 0 : index
    %8 = vector.load %arg5[%c0_6, %c0_7] : memref<64x128xf32, #tpu.memory_space<vmem>>, vector<64x128xf32>
    %cst_8 = arith.constant dense<0.000000e+00> : vector<8x128xf32>
    %9 = tpu.matmul %7, %8, %cst_8 {dimension_numbers = #tpu.dot_dimension_numbers<[1], [0], [0], [1], [0, 0, 1, 1], [], []>} : vector<8x64xf32>, vector<64x128xf32>, vector<8x128xf32> -> vector<8x128xf32>
    %c0_9 = arith.constant 0 : index
    %c0_10 = arith.constant 0 : index
    %10 = vector.load %arg6[%c0_9, %c0_10] : memref<1x128xf32, #tpu.memory_space<vmem>>, vector<1x128xf32>
    %11 = vector.broadcast %10 : vector<1x128xf32> to vector<8x128xf32>
    %12 = arith.addf %9, %11 : vector<8x128xf32>
    %c0_11 = arith.constant 0 : index
    %c0_12 = arith.constant 0 : index
    %13 = vector.load %arg2[%c0_11, %c0_12] : memref<52x128xf32, #tpu.memory_space<vmem>>, vector<52x128xf32>
    %14 = vector.shape_cast %13 : vector<52x128xf32> to vector<1x52x128xf32>
    %15 = vector.shape_cast %12 : vector<8x128xf32> to vector<8x1x128xf32>
    %16 = vector.broadcast %14 : vector<1x52x128xf32> to vector<8x52x128xf32>
    %17 = vector.broadcast %15 : vector<8x1x128xf32> to vector<8x52x128xf32>
    %18 = arith.addf %16, %17 : vector<8x52x128xf32>
    %c0_13 = arith.constant 0 : index
    %c0_14 = arith.constant 0 : index
    %c0_15 = arith.constant 0 : index
    %19 = vector.load %arg7[%c0_13, %c0_14, %c0_15] : memref<8x52x128xf32, #tpu.memory_space<vmem>>, vector<8x52x128xf32>
    tpu.vector_store %arg7[%c0_13, %c0_14, %c0_15], %18 {strides = array<i32>} : memref<8x52x128xf32, #tpu.memory_space<vmem>>, vector<8x52x128xf32>,
    return
  }
  func.func @transform_0(%arg0: i32) -> (i32, i32) {
    %c0_i32 = arith.constant 0 : i32
    %c0_i32_0 = arith.constant 0 : i32
    return %arg0, %c0_i32 : i32, i32
  }
  func.func @transform_1(%arg0: i32) -> (i32, i32) {
    %c0_i32 = arith.constant 0 : i32
    %c0_i32_0 = arith.constant 0 : i32
    %c0_i32_1 = arith.constant 0 : i32
    return %c0_i32, %c0_i32_0 : i32, i32
  }
  func.func @transform_2(%arg0: i32) -> (i32, i32) {
    %c0_i32 = arith.constant 0 : i32
    %c0_i32_0 = arith.constant 0 : i32
    %c0_i32_1 = arith.constant 0 : i32
    return %c0_i32, %c0_i32_0 : i32, i32
  }
  func.func @transform_3(%arg0: i32) -> (i32, i32) {
    %c0_i32 = arith.constant 0 : i32
    %c0_i32_0 = arith.constant 0 : i32
    %c0_i32_1 = arith.constant 0 : i32
    return %c0_i32, %c0_i32_0 : i32, i32
  }
  func.func @transform_4(%arg0: i32) -> (i32, i32) {
    %c0_i32 = arith.constant 0 : i32
    %c0_i32_0 = arith.constant 0 : i32
    %c0_i32_1 = arith.constant 0 : i32
    return %c0_i32, %c0_i32_0 : i32, i32
  }
  func.func @transform_5(%arg0: i32) -> (i32, i32) {
    %c0_i32 = arith.constant 0 : i32
    %c0_i32_0 = arith.constant 0 : i32
    %c0_i32_1 = arith.constant 0 : i32
    return %c0_i32, %c0_i32_0 : i32, i32
  }
  func.func @transform_6(%arg0: i32) -> (i32, i32, i32) {
    %c0_i32 = arith.constant 0 : i32
    %c0_i32_0 = arith.constant 0 : i32
    %c0_i32_1 = arith.constant 0 : i32
    return %arg0, %c0_i32, %c0_i32_0 : i32, i32, i32
  }
}

</mosaic_0001>

<bundles_post_ra>
// kernel: tpu_custom_call.1
= control target key start
LH: loop header
LB: loop body
LE: loop exit
PB: predicated region body
PF: predicated region fallthrough
CT: control target
= control target key end

     0   :  { %11 = vsyncpa [#allocation3], 0  ;;  %s909_s0 = inlined_call_operand.hbm [shape: f32[2,52], index: 0, kind: input, shape index: {}]   ;;  %s910_s1 = inlined_call_operand.hbm [shape: f32[52,128], index: 1, kind: input, shape index: {}]   ;;  %s911_s2 = inlined_call_operand.hbm [shape: f32[52,64], index: 2, kind: input, shape index: {}]   ;;  %s912_s3 = inlined_call_operand.vmem [shape: f32[1,64], index: 3, kind: input, shape index: {}]   ;;  %s913_s4 = inlined_call_operand.hbm [shape: f32[64,128], index: 4, kind: input, shape index: {}]   ;;  %s914_s5 = inlined_call_operand.vmem [shape: f32[1,128], index: 5, kind: input, shape index: {}]   ;;  %s915_s6 = inlined_call_operand.vmem [shape: f32[2,52,128], index: 6, kind: output, shape index: {}]  }
   0x1   :  { %12 = vsyncpa [#allocation5], 0 }
   0x2   :  { %13 = vsyncpa [#allocation8], 0 }
   0x3   :  { %18 = vsyncadd [#allocation3], 96  ;;  %s750_s21 = smov [#allocation4]   ;;  %s656_s25 = scalar_lea.hbm %s910_s1, 896 }
   0x4   :  { %s31_s22 = sshll.u32 %s750_s21, 4  ;;  %p657_p0 = scmp.ne.s32.totalorder %s910_s1, %s656_s25  ;;  %s32_s22 = int_to_ptr.vmem [resolvable:$true] %s31_s22 }
   0x5   :  { %p660_p1 = scmp.lt.u32.totalorder %s656_s25, %s910_s1 }
   0x7   :  { %p662_p2 = pnand %p660_p1, %p657_p0 }
   0x9   :  { %665 = shalt.err (!%p662_p2)
}
   0xa   :  { %s666_s30 = scalar_lea.vmem %s32_s22, 896  ;;  %p671_p4 = scmp.lt.s32.totalorder %s32_s22, %s32_s22 }
   0xb   :  { %p667_p3 = scmp.ne.s32.totalorder %s32_s22, %s666_s30  ;;  %p672_p5 = scmp.lt.s32.totalorder %s666_s30, %s666_s30 }
   0xd   :  { %p673_p6 = por %p672_p5, %p671_p4 }
   0xf   :  { %p674_p7 = pnand %p673_p6, %p667_p3 }
  0x11   :  { %677 = shalt.err (!%p674_p7)
}
  0x12   :  { %s751_s7 = smov 128   ;;  %s752_s8 = smov 8  }
  0x13   :  { %37 = dma.hbm_to_vmem [thread:$0]  %s910_s1, 896, %s32_s22, [#allocation5], %s751_s7, %s751_s7, %s752_s8  }
  0x14   :  { %s753_s11 = smov [#allocation2]   ;;  %s678_s15 = scalar_lea.hbm %s909_s0, 32 }
  0x15   :  { %s19_s12 = sshll.u32 %s753_s11, 4  ;;  %p679_p8 = scmp.ne.s32.totalorder %s909_s0, %s678_s15  ;;  %s20_s12 = int_to_ptr.vmem [resolvable:$true] %s19_s12 }
  0x16   :  { %p682_p9 = scmp.lt.u32.totalorder %s678_s15, %s909_s0 }
  0x18   :  { %p684_p10 = pnand %p682_p9, %p679_p8 }
  0x1a   :  { %687 = shalt.err (!%p684_p10)
}
  0x1b   :  { %s688_s20 = scalar_lea.vmem %s20_s12, 32  ;;  %s692_s1 = scalar_lea.vmem %s20_s12, 128 }
  0x1c   :  { %p689_p11 = scmp.ne.s32.totalorder %s20_s12, %s688_s20  ;;  %p693_p12 = scmp.lt.s32.totalorder %s20_s12, %s20_s12 }
  0x1d   :  { %p694_p13 = scmp.lt.s32.totalorder %s692_s1, %s688_s20 }
  0x1f   :  { %p695_p0 = por %p694_p13, %p693_p12 }
  0x21   :  { %p696_p1 = pnand %p695_p0, %p689_p11 }
  0x23   :  { %699 = shalt.err (!%p696_p1)
}
  0x24   :  { %s754_s21 = smov 32   ;;  %s755_s22 = smov 2  }
  0x25   :  { %25 = dma.hbm_to_vmem [thread:$0]  %s909_s0, 32, %s20_s12, [#allocation3], %s754_s21, %s754_s21, %s755_s22  }
  0x26   :  { %s756_s25 = smov [#allocation6]   ;;  %s757_s27 = smov [#allocation7]  }
  0x27   :  { %s43_s26 = sshll.u32 %s756_s25, 4  ;;  %s57_s28 = sshll.u32 %s757_s27, 4  ;;  %s44_s26 = int_to_ptr.vmem [resolvable:$true] %s43_s26  ;;  %s824_s28 = int_to_ptr.vmem [resolvable:$true] %s57_s28 }
  0x28   :  { %s700_s9 = scalar_lea.hbm %s911_s2, 896 }
  0x29   :  { %p701_p2 = scmp.ne.s32.totalorder %s911_s2, %s700_s9  ;;  %p704_p3 = scmp.lt.u32.totalorder %s700_s9, %s911_s2 }
  0x2b   :  { %p706_p4 = pnand %p704_p3, %p701_p2 }
  0x2d   :  { %709 = shalt.err (!%p706_p4)
}
  0x2e   :  { %s710_s0 = scalar_lea.vmem %s44_s26, 896  ;;  %p715_p6 = scmp.lt.s32.totalorder %s44_s26, %s44_s26 }
  0x2f   :  { %p711_p5 = scmp.ne.s32.totalorder %s44_s26, %s710_s0  ;;  %p716_p7 = scmp.lt.s32.totalorder %s710_s0, %s710_s0 }
  0x31   :  { %p717_p8 = por %p716_p7, %p715_p6 }
  0x33   :  { %p718_p9 = pnand %p717_p8, %p711_p5 }
  0x35   :  { %721 = shalt.err (!%p718_p9)
}
  0x36   :  { %49 = dma.hbm_to_vmem [thread:$0]  %s911_s2, 896, %s44_s26, [#allocation5], %s751_s7, %s751_s7, %s752_s8  }
  0x37   :  { %s722_s18 = scalar_lea.hbm %s913_s4, 1024 }
  0x38   :  { %p723_p10 = scmp.ne.s32.totalorder %s913_s4, %s722_s18  ;;  %p726_p11 = scmp.lt.u32.totalorder %s722_s18, %s913_s4 }
  0x3a   :  { %p728_p12 = pnand %p726_p11, %p723_p10 }
  0x3c   :  { %731 = shalt.err (!%p728_p12)
}
  0x3d   :  { %s732_s22 = scalar_lea.vmem %s824_s28, 1024  ;;  %p737_p0 = scmp.lt.s32.totalorder %s824_s28, %s824_s28 }
  0x3e   :  { %p733_p13 = scmp.ne.s32.totalorder %s824_s28, %s732_s22  ;;  %p738_p1 = scmp.lt.s32.totalorder %s732_s22, %s732_s22 }
  0x40   :  { %p739_p2 = por %p738_p1, %p737_p0 }
  0x42   :  { %p740_p3 = pnand %p739_p2, %p733_p13 }
  0x44   :  { %743 = shalt.err (!%p740_p3)
}
  0x45   :  { %63 = dma.hbm_to_vmem [thread:$0]  %s913_s4, 1024, %s824_s28, [#allocation8], %s751_s7, %s751_s7, %s752_s8  }
  0x46   :  { %744 = dma.done.wait [#allocation3], 128  }
  0x47   :  { %745 = vsyncadd [#allocation3], 4294967168 }
  0x48   :  { %746 = dma.done.wait [#allocation5], 1792  }
  0x49   :  { %747 = vsyncadd [#allocation5], 4294965504 }
  0x4a   :  { %748 = dma.done.wait [#allocation8], 1024  }
  0x4b   :  { %749 = vsyncadd [#allocation8], 4294966272  ;;  %v758_v0 = vmov 0.0|0.0   ;;  %vm759_vm0 = vmmov 0   ;;  %v760_v1 = vmov 0.0   ;;  %v79_v2 = vld [vmem:[#allocation6] sm:$0xff]  ;;  %v273_v32 = vlaneseq }
  0x4c   :  { %623 = vmatprep.subr.bf16.mxu0 %v758_v0  ;;  %601 = vmatprep.mubr.msk.f32.mxu0 %vm759_vm0, %v760_v1  ;;  %v80_v3 = vld [vmem:[#allocation6 + $0x8] sm:$0xff]  ;;  %v81_v4 = vld [vmem:[#allocation6 + $0x10] sm:$0xff]  ;;  %v82_v6 = vld [vmem:[#allocation6 + $0x18] sm:$0xff]  ;;  %vm97_vm1 = vcmask 1043456   ;;  %vm93_vm2 = vcmask 424960   ;;  %vm187_vm3 = vcmask 523264  }
  0x4d   :  { %632 = vmatprep.subr.bf16.mxu1 %v758_v0  ;;  %620 = vmatprep.mubr.msk.f32.mxu1 %vm759_vm0, %v760_v1  ;;  %v624_v5 = vpack.c.bf16 %v80_v3, %v79_v2  ;;  %v172_v7 = vld [vmem:[#allocation7] sm:$0xff]  ;;  %v627_v8 = vpack.c.bf16 %v82_v6, %v81_v4  ;;  %v173_v9 = vld [vmem:[#allocation7 + $0x8] sm:$0xff]  ;;  %v174_v10 = vld [vmem:[#allocation7 + $0x10] sm:$0xff]  ;;  %v761_v30 = vmov 1966171168   ;;  %v274_v34 = vshrl.u32 %v273_v32, 7 }
  0x4e   :  { %v175_v11 = vld [vmem:[#allocation7 + $0x18] sm:$0xff]  ;;  %v83_v12 = vld [vmem:[#allocation6 + $0x20] sm:$0xff]  ;;  %v84_v13 = vld [vmem:[#allocation6 + $0x28] sm:$0xff]  ;;  %v633_v14 = vpack.c.bf16 %v173_v9, %v172_v7  ;;  %v271_v31 = vunpack.c.l.s4 %v761_v30 }
  0x4f   :  { %625 = vmatpush3.bf16.msra.mxu0 %v624_v5  ;;  %v636_v15 = vpack.c.bf16 %v175_v11, %v174_v10  ;;  %v630_v16 = vpack.c.bf16 %v84_v13, %v83_v12  ;;  %v176_v17 = vld [vmem:[#allocation7 + $0x20] sm:$0xff]  ;;  %v177_v18 = vld [vmem:[#allocation7 + $0x28] sm:$0xff]  ;;  %v85_v20 = vld [vmem:[#allocation6 + $0x30] sm:$0xf]  ;;  %v320_v41 = vsub.s32 0, %v274_v34 }
  0x50   :  { %626 = vmatprep.subr.bf16.mxu0 %v758_v0  ;;  %634 = vmatpush3.bf16.msra.mxu1 %v633_v14  ;;  %v639_v19 = vpack.c.bf16 %v177_v18, %v176_v17  ;;  %v78_v21 = vld [vmem:[#allocation2] sm:$0xff]  ;;  %v178_v22 = vld [vmem:[#allocation7 + $0x30] sm:$0xff]  ;;  %v179_v23 = vld [vmem:[#allocation7 + $0x38] sm:$0xff]  ;;  %v272_v33 = vunpack.c.0.s8 %v271_v31 }
  0x51   :  { %635 = vmatprep.subr.bf16.mxu1 %v758_v0  ;;  %v642_v24 = vpack.c.bf16 %v179_v23, %v178_v22  ;;  %v565_v25 = vld [vmem:[%s912_s3] ss:$0 sm:$0xff]  ;;  %v261_v44 = vld [vmem:[#allocation4] sm:$0xff]  ;;  %v262_v45 = vld [vmem:[#allocation4 + $0x8] sm:$0xff] }
  0x52   :  { %v568_v35 = vld [vmem:[%s914_s5] ss:$0 sm:$0xff]  ;;  %v275_v36 = vsub.s32 %v272_v33, %v274_v34  ;;  %v263_v47 = vld [vmem:[#allocation4 + $0x10] sm:$0xff]  ;;  %v265_v50 = vld [vmem:[#allocation4 + $0x20] sm:$0xff] }
  0x53   :  { %628 = vmatpush3.bf16.msra.mxu0 %v627_v8  ;;  %v264_v49 = vld [vmem:[#allocation4 + $0x18] sm:$0xff]  ;;  %v266_v51 = vld [vmem:[#allocation4 + $0x28] sm:$0xff]  ;;  %v267_v53 = vld [vmem:[#allocation4 + $0x30] sm:$0xf] }
  0x54   :  { %629 = vmatprep.subr.bf16.mxu0 %v758_v0  ;;  %637 = vmatpush3.bf16.msra.mxu1 %v636_v15 }
  0x55   :  { %638 = vmatprep.subr.bf16.mxu1 %v758_v0 }
  0x57   :  { %631 = vmatpush3.bf16.msra.mxu0 %v630_v16 }
  0x58   :  { %599 = vmatprep.subr.mxu0 %v760_v1  ;;  %640 = vmatpush3.bf16.msra.mxu1 %v639_v19 }
  0x59   :  { %641 = vmatprep.subr.bf16.mxu1 %v758_v0 }
  0x5b   :  { %600 = vmatpush3.msk.msra.mxu0 %vm97_vm1, %v85_v20 }
  0x5c   :  { %602 = vmatmul.mubr.msk.f32.vlgmr.msra.gmra.mrb[0].mxu0 %vm93_vm2, %v78_v21  ;;  %643 = vmatpush3.bf16.msra.mxu1 %v642_v24 }
 0x12f   :  { %v167_v26 = vpop.f32.mrb[0].mxu0 }
 0x130   :  { %v168_v27 = vadd.f32 %v565_v25, %v167_v26  ;;  %v603_v28 = vpop.f32.mrb[1].mxu0 }
 0x132   :  { %v171_v29 = vmax.f32 %v168_v27, 0.0 }
 0x134   :  { %621 = vmatmul.mubr.msk.f32.vlgmr.msra.gmra.mrb[0].mxu1 %vm187_vm3, %v171_v29 }
 0x207   :  { %v257_v37 = vpop.f32.mrb[0].mxu1 }
 0x208   :  { %v258_v38 = vadd.f32 %v568_v35, %v257_v37  ;;  %v622_v39 = vpop.f32.mrb[1].mxu1 }
 0x20a   :  { %v276_v40 = vrot.slane %v258_v38, %v275_v36 }
 0x20c   :  { %v284_v42 = vcombine.high %v276_v40, %v276_v40  ;;  %v292_v43 = vrot.slane %v276_v40, %v275_v36 }
 0x20e   :  { %v306_v46 = vrot.slane %v284_v42, %v275_v36  ;;  %v321_v48 = vrot.slane %v292_v43, %v320_v41 }
 0x210   :  { %v325_v52 = vrot.slane %v306_v46, %v320_v41  ;;  %v358_v54 = vadd.f32 %v321_v48, %v261_v44  ;;  %v359_v55 = vadd.f32 %v321_v48, %v262_v45  ;;  %v360_v56 = vadd.f32 %v321_v48, %v263_v47 }
 0x211   :  { %v361_v57 = vadd.f32 %v321_v48, %v264_v49  ;;  %v362_v58 = vadd.f32 %v321_v48, %v265_v50  ;;  %v363_v59 = vadd.f32 %v321_v48, %v266_v51  ;;  %v364_v60 = vadd.f32 %v321_v48, %v267_v53 }
 0x212   :  { %526 = vst [vmem:[%s915_s6] sm:$0xff] %v358_v54  ;;  %528 = vst [vmem:[%s915_s6 + $0x8] sm:$0xff] %v359_v55  ;;  %v365_v61 = vadd.f32 %v325_v52, %v261_v44  ;;  %v366_v62 = vadd.f32 %v325_v52, %v262_v45  ;;  %v367_v63 = vadd.f32 %v325_v52, %v263_v47 }
 0x213   :  { %v368_v0 = vadd.f32 %v325_v52, %v264_v49  ;;  %v369_v1 = vadd.f32 %v325_v52, %v265_v50  ;;  %v370_v2 = vadd.f32 %v325_v52, %v266_v51  ;;  %530 = vst [vmem:[%s915_s6 + $0x10] sm:$0xff] %v360_v56  ;;  %532 = vst [vmem:[%s915_s6 + $0x18] sm:$0xff] %v361_v57 }
 0x214   :  { %534 = vst [vmem:[%s915_s6 + $0x20] sm:$0xff] %v362_v58  ;;  %536 = vst [vmem:[%s915_s6 + $0x28] sm:$0xff] %v363_v59  ;;  %v371_v3 = vadd.f32 %v325_v52, %v267_v53 }
 0x215   :  { %420 = vst [vmem:[#allocation9 + $0x30] sm:$0xf] %v364_v60  ;;  %540 = vst [vmem:[%s915_s6 + $0x38] sm:$0xff] %v365_v61 }
 0x216   :  { %542 = vst [vmem:[%s915_s6 + $0x40] sm:$0xff] %v366_v62  ;;  %544 = vst [vmem:[%s915_s6 + $0x48] sm:$0xff] %v367_v63 }
 0x217   :  { %546 = vst [vmem:[%s915_s6 + $0x50] sm:$0xff] %v368_v0  ;;  %548 = vst [vmem:[%s915_s6 + $0x58] sm:$0xff] %v369_v1 }
 0x218   :  { %550 = vst [vmem:[%s915_s6 + $0x60] sm:$0xff] %v370_v2  ;;  %427 = vst [vmem:[#allocation9 + $0x68] sm:$0xf] %v371_v3 }
 0x21c   :  { %v537_v4 = vld [vmem:[#allocation9 + $0x30] sm:$0xff] }
 0x21d   :  { %538 = vst [vmem:[%s915_s6 + $0x30] sm:$0xff] %v537_v4 }
 0x21f   :  { %v551_v5 = vld [vmem:[#allocation9 + $0x68] sm:$0xff] }
 0x220   :  { %552 = vst [vmem:[%s915_s6 + $0x68] sm:$0xff] %v551_v5 }
 0x221   :  { %558 = vsyncpa [#allocation3], 1 }
 0x222   :  { %559 = vsyncpa [#allocation5], 1 }
 0x223   :  { %560 = vsyncpa [#allocation8], 1 }

// kernel: tpu_custom_call.1
= control target key start
LH: loop header
LB: loop body
LE: loop exit
PB: predicated region body
PF: predicated region fallthrough
CT: control target
= control target key end

     0   :  { %11 = vsyncpa [#allocation3], 0  ;;  %s909_s0 = inlined_call_operand.hbm [shape: f32[2,52], index: 0, kind: input, shape index: {}]   ;;  %s910_s1 = inlined_call_operand.hbm [shape: f32[52,128], index: 1, kind: input, shape index: {}]   ;;  %s911_s2 = inlined_call_operand.hbm [shape: f32[52,64], index: 2, kind: input, shape index: {}]   ;;  %s912_s3 = inlined_call_operand.vmem [shape: f32[1,64], index: 3, kind: input, shape index: {}]   ;;  %s913_s4 = inlined_call_operand.hbm [shape: f32[64,128], index: 4, kind: input, shape index: {}]   ;;  %s914_s5 = inlined_call_operand.vmem [shape: f32[1,128], index: 5, kind: input, shape index: {}]   ;;  %s915_s6 = inlined_call_operand.vmem [shape: f32[2,52,128], index: 6, kind: output, shape index: {}]  }
   0x1   :  { %12 = vsyncpa [#allocation5], 0 }
   0x2   :  { %13 = vsyncpa [#allocation8], 0 }
   0x3   :  { %18 = vsyncadd [#allocation3], 96  ;;  %s750_s21 = smov [#allocation4]   ;;  %s656_s25 = scalar_lea.hbm %s910_s1, 896 }
   0x4   :  { %s31_s22 = sshll.u32 %s750_s21, 4  ;;  %p657_p0 = scmp.ne.s32.totalorder %s910_s1, %s656_s25  ;;  %s32_s22 = int_to_ptr.vmem [resolvable:$true] %s31_s22 }
   0x5   :  { %p660_p1 = scmp.lt.u32.totalorder %s656_s25, %s910_s1 }
   0x7   :  { %p662_p2 = pnand %p660_p1, %p657_p0 }
   0x9   :  { %665 = shalt.err (!%p662_p2)
}
   0xa   :  { %s666_s30 = scalar_lea.vmem %s32_s22, 896  ;;  %p671_p4 = scmp.lt.s32.totalorder %s32_s22, %s32_s22 }
   0xb   :  { %p667_p3 = scmp.ne.s32.totalorder %s32_s22, %s666_s30  ;;  %p672_p5 = scmp.lt.s32.totalorder %s666_s30, %s666_s30 }
   0xd   :  { %p673_p6 = por %p672_p5, %p671_p4 }
   0xf   :  { %p674_p7 = pnand %p673_p6, %p667_p3 }
  0x11   :  { %677 = shalt.err (!%p674_p7)
}
  0x12   :  { %s751_s7 = smov 128   ;;  %s752_s8 = smov 8  }
  0x13   :  { %37 = dma.hbm_to_vmem [thread:$0]  %s910_s1, 896, %s32_s22, [#allocation5], %s751_s7, %s751_s7, %s752_s8  }
  0x14   :  { %s753_s11 = smov [#allocation2]   ;;  %s678_s15 = scalar_lea.hbm %s909_s0, 32 }
  0x15   :  { %s19_s12 = sshll.u32 %s753_s11, 4  ;;  %p679_p8 = scmp.ne.s32.totalorder %s909_s0, %s678_s15  ;;  %s20_s12 = int_to_ptr.vmem [resolvable:$true] %s19_s12 }
  0x16   :  { %p682_p9 = scmp.lt.u32.totalorder %s678_s15, %s909_s0 }
  0x18   :  { %p684_p10 = pnand %p682_p9, %p679_p8 }
  0x1a   :  { %687 = shalt.err (!%p684_p10)
}
  0x1b   :  { %s688_s20 = scalar_lea.vmem %s20_s12, 32  ;;  %s692_s1 = scalar_lea.vmem %s20_s12, 128 }
  0x1c   :  { %p689_p11 = scmp.ne.s32.totalorder %s20_s12, %s688_s20  ;;  %p693_p12 = scmp.lt.s32.totalorder %s20_s12, %s20_s12 }
  0x1d   :  { %p694_p13 = scmp.lt.s32.totalorder %s692_s1, %s688_s20 }
  0x1f   :  { %p695_p0 = por %p694_p13, %p693_p12 }
  0x21   :  { %p696_p1 = pnand %p695_p0, %p689_p11 }
  0x23   :  { %699 = shalt.err (!%p696_p1)
}
  0x24   :  { %s754_s21 = smov 32   ;;  %s755_s22 = smov 2  }
  0x25   :  { %25 = dma.hbm_to_vmem [thread:$0]  %s909_s0, 32, %s20_s12, [#allocation3], %s754_s21, %s754_s21, %s755_s22  }
  0x26   :  { %s756_s25 = smov [#allocation6]   ;;  %s757_s27 = smov [#allocation7]  }
  0x27   :  { %s43_s26 = sshll.u32 %s756_s25, 4  ;;  %s57_s28 = sshll.u32 %s757_s27, 4  ;;  %s44_s26 = int_to_ptr.vmem [resolvable:$true] %s43_s26  ;;  %s824_s28 = int_to_ptr.vmem [resolvable:$true] %s57_s28 }
  0x28   :  { %s700_s9 = scalar_lea.hbm %s911_s2, 896 }
  0x29   :  { %p701_p2 = scmp.ne.s32.totalorder %s911_s2, %s700_s9  ;;  %p704_p3 = scmp.lt.u32.totalorder %s700_s9, %s911_s2 }
  0x2b   :  { %p706_p4 = pnand %p704_p3, %p701_p2 }
  0x2d   :  { %709 = shalt.err (!%p706_p4)
}
  0x2e   :  { %s710_s0 = scalar_lea.vmem %s44_s26, 896  ;;  %p715_p6 = scmp.lt.s32.totalorder %s44_s26, %s44_s26 }
  0x2f   :  { %p711_p5 = scmp.ne.s32.totalorder %s44_s26, %s710_s0  ;;  %p716_p7 = scmp.lt.s32.totalorder %s710_s0, %s710_s0 }
  0x31   :  { %p717_p8 = por %p716_p7, %p715_p6 }
  0x33   :  { %p718_p9 = pnand %p717_p8, %p711_p5 }
  0x35   :  { %721 = shalt.err (!%p718_p9)
}
  0x36   :  { %49 = dma.hbm_to_vmem [thread:$0]  %s911_s2, 896, %s44_s26, [#allocation5], %s751_s7, %s751_s7, %s752_s8  }
  0x37   :  { %s722_s18 = scalar_lea.hbm %s913_s4, 1024 }
  0x38   :  { %p723_p10 = scmp.ne.s32.totalorder %s913_s4, %s722_s18  ;;  %p726_p11 = scmp.lt.u32.totalorder %s722_s18, %s913_s4 }
  0x3a   :  { %p728_p12 = pnand %p726_p11, %p723_p10 }
  0x3c   :  { %731 = shalt.err (!%p728_p12)
}
  0x3d   :  { %s732_s22 = scalar_lea.vmem %s824_s28, 1024  ;;  %p737_p0 = scmp.lt.s32.totalorder %s824_s28, %s824_s28 }
  0x3e   :  { %p733_p13 = scmp.ne.s32.totalorder %s824_s28, %s732_s22  ;;  %p738_p1 = scmp.lt.s32.totalorder %s732_s22, %s732_s22 }
  0x40   :  { %p739_p2 = por %p738_p1, %p737_p0 }
  0x42   :  { %p740_p3 = pnand %p739_p2, %p733_p13 }
  0x44   :  { %743 = shalt.err (!%p740_p3)
}
  0x45   :  { %63 = dma.hbm_to_vmem [thread:$0]  %s913_s4, 1024, %s824_s28, [#allocation8], %s751_s7, %s751_s7, %s752_s8  }
  0x46   :  { %744 = dma.done.wait [#allocation3], 128  }
  0x47   :  { %745 = vsyncadd [#allocation3], 4294967168 }
  0x48   :  { %746 = dma.done.wait [#allocation5], 1792  }
  0x49   :  { %747 = vsyncadd [#allocation5], 4294965504 }
  0x4a   :  { %748 = dma.done.wait [#allocation8], 1024  }
  0x4b   :  { %749 = vsyncadd [#allocation8], 4294966272  ;;  %v758_v0 = vmov 0.0|0.0   ;;  %vm759_vm0 = vmmov 0   ;;  %v760_v1 = vmov 0.0   ;;  %v79_v2 = vld [vmem:[#allocation6] sm:$0xff]  ;;  %v273_v32 = vlaneseq }
  0x4c   :  { %623 = vmatprep.subr.bf16.mxu0 %v758_v0  ;;  %601 = vmatprep.mubr.msk.f32.mxu0 %vm759_vm0, %v760_v1  ;;  %v80_v3 = vld [vmem:[#allocation6 + $0x8] sm:$0xff]  ;;  %v81_v4 = vld [vmem:[#allocation6 + $0x10] sm:$0xff]  ;;  %v82_v6 = vld [vmem:[#allocation6 + $0x18] sm:$0xff]  ;;  %vm97_vm1 = vcmask 1043456   ;;  %vm93_vm2 = vcmask 424960   ;;  %vm187_vm3 = vcmask 523264  }
  0x4d   :  { %632 = vmatprep.subr.bf16.mxu1 %v758_v0  ;;  %620 = vmatprep.mubr.msk.f32.mxu1 %vm759_vm0, %v760_v1  ;;  %v624_v5 = vpack.c.bf16 %v80_v3, %v79_v2  ;;  %v172_v7 = vld [vmem:[#allocation7] sm:$0xff]  ;;  %v627_v8 = vpack.c.bf16 %v82_v6, %v81_v4  ;;  %v173_v9 = vld [vmem:[#allocation7 + $0x8] sm:$0xff]  ;;  %v174_v10 = vld [vmem:[#allocation7 + $0x10] sm:$0xff]  ;;  %v761_v30 = vmov 1966171168   ;;  %v274_v34 = vshrl.u32 %v273_v32, 7 }
  0x4e   :  { %v175_v11 = vld [vmem:[#allocation7 + $0x18] sm:$0xff]  ;;  %v83_v12 = vld [vmem:[#allocation6 + $0x20] sm:$0xff]  ;;  %v84_v13 = vld [vmem:[#allocation6 + $0x28] sm:$0xff]  ;;  %v633_v14 = vpack.c.bf16 %v173_v9, %v172_v7  ;;  %v271_v31 = vunpack.c.l.s4 %v761_v30 }
  0x4f   :  { %625 = vmatpush3.bf16.msra.mxu0 %v624_v5  ;;  %v636_v15 = vpack.c.bf16 %v175_v11, %v174_v10  ;;  %v630_v16 = vpack.c.bf16 %v84_v13, %v83_v12  ;;  %v176_v17 = vld [vmem:[#allocation7 + $0x20] sm:$0xff]  ;;  %v177_v18 = vld [vmem:[#allocation7 + $0x28] sm:$0xff]  ;;  %v85_v20 = vld [vmem:[#allocation6 + $0x30] sm:$0xf]  ;;  %v320_v41 = vsub.s32 0, %v274_v34 }
  0x50   :  { %626 = vmatprep.subr.bf16.mxu0 %v758_v0  ;;  %634 = vmatpush3.bf16.msra.mxu1 %v633_v14  ;;  %v639_v19 = vpack.c.bf16 %v177_v18, %v176_v17  ;;  %v78_v21 = vld [vmem:[#allocation2] sm:$0xff]  ;;  %v178_v22 = vld [vmem:[#allocation7 + $0x30] sm:$0xff]  ;;  %v179_v23 = vld [vmem:[#allocation7 + $0x38] sm:$0xff]  ;;  %v272_v33 = vunpack.c.0.s8 %v271_v31 }
  0x51   :  { %635 = vmatprep.subr.bf16.mxu1 %v758_v0  ;;  %v642_v24 = vpack.c.bf16 %v179_v23, %v178_v22  ;;  %v565_v25 = vld [vmem:[%s912_s3] ss:$0 sm:$0xff]  ;;  %v261_v44 = vld [vmem:[#allocation4] sm:$0xff]  ;;  %v262_v45 = vld [vmem:[#allocation4 + $0x8] sm:$0xff] }
  0x52   :  { %v568_v35 = vld [vmem:[%s914_s5] ss:$0 sm:$0xff]  ;;  %v275_v36 = vsub.s32 %v272_v33, %v274_v34  ;;  %v263_v47 = vld [vmem:[#allocation4 + $0x10] sm:$0xff]  ;;  %v265_v50 = vld [vmem:[#allocation4 + $0x20] sm:$0xff] }
  0x53   :  { %628 = vmatpush3.bf16.msra.mxu0 %v627_v8  ;;  %v264_v49 = vld [vmem:[#allocation4 + $0x18] sm:$0xff]  ;;  %v266_v51 = vld [vmem:[#allocation4 + $0x28] sm:$0xff]  ;;  %v267_v53 = vld [vmem:[#allocation4 + $0x30] sm:$0xf] }
  0x54   :  { %629 = vmatprep.subr.bf16.mxu0 %v758_v0  ;;  %637 = vmatpush3.bf16.msra.mxu1 %v636_v15 }
  0x55   :  { %638 = vmatprep.subr.bf16.mxu1 %v758_v0 }
  0x57   :  { %631 = vmatpush3.bf16.msra.mxu0 %v630_v16 }
  0x58   :  { %599 = vmatprep.subr.mxu0 %v760_v1  ;;  %640 = vmatpush3.bf16.msra.mxu1 %v639_v19 }
  0x59   :  { %641 = vmatprep.subr.bf16.mxu1 %v758_v0 }
  0x5b   :  { %600 = vmatpush3.msk.msra.mxu0 %vm97_vm1, %v85_v20 }
  0x5c   :  { %602 = vmatmul.mubr.msk.f32.vlgmr.msra.gmra.mrb[0].mxu0 %vm93_vm2, %v78_v21  ;;  %643 = vmatpush3.bf16.msra.mxu1 %v642_v24 }
 0x12f   :  { %v167_v26 = vpop.f32.mrb[0].mxu0 }
 0x130   :  { %v168_v27 = vadd.f32 %v565_v25, %v167_v26  ;;  %v603_v28 = vpop.f32.mrb[1].mxu0 }
 0x132   :  { %v171_v29 = vmax.f32 %v168_v27, 0.0 }
 0x134   :  { %621 = vmatmul.mubr.msk.f32.vlgmr.msra.gmra.mrb[0].mxu1 %vm187_vm3, %v171_v29 }
 0x207   :  { %v257_v37 = vpop.f32.mrb[0].mxu1 }
 0x208   :  { %v258_v38 = vadd.f32 %v568_v35, %v257_v37  ;;  %v622_v39 = vpop.f32.mrb[1].mxu1 }
 0x20a   :  { %v276_v40 = vrot.slane %v258_v38, %v275_v36 }
 0x20c   :  { %v284_v42 = vcombine.high %v276_v40, %v276_v40  ;;  %v292_v43 = vrot.slane %v276_v40, %v275_v36 }
 0x20e   :  { %v306_v46 = vrot.slane %v284_v42, %v275_v36  ;;  %v321_v48 = vrot.slane %v292_v43, %v320_v41 }
 0x210   :  { %v325_v52 = vrot.slane %v306_v46, %v320_v41  ;;  %v358_v54 = vadd.f32 %v321_v48, %v261_v44  ;;  %v359_v55 = vadd.f32 %v321_v48, %v262_v45  ;;  %v360_v56 = vadd.f32 %v321_v48, %v263_v47 }
 0x211   :  { %v361_v57 = vadd.f32 %v321_v48, %v264_v49  ;;  %v362_v58 = vadd.f32 %v321_v48, %v265_v50  ;;  %v363_v59 = vadd.f32 %v321_v48, %v266_v51  ;;  %v364_v60 = vadd.f32 %v321_v48, %v267_v53 }
 0x212   :  { %526 = vst [vmem:[%s915_s6] sm:$0xff] %v358_v54  ;;  %528 = vst [vmem:[%s915_s6 + $0x8] sm:$0xff] %v359_v55  ;;  %v365_v61 = vadd.f32 %v325_v52, %v261_v44  ;;  %v366_v62 = vadd.f32 %v325_v52, %v262_v45  ;;  %v367_v63 = vadd.f32 %v325_v52, %v263_v47 }
 0x213   :  { %v368_v0 = vadd.f32 %v325_v52, %v264_v49  ;;  %v369_v1 = vadd.f32 %v325_v52, %v265_v50  ;;  %v370_v2 = vadd.f32 %v325_v52, %v266_v51  ;;  %530 = vst [vmem:[%s915_s6 + $0x10] sm:$0xff] %v360_v56  ;;  %532 = vst [vmem:[%s915_s6 + $0x18] sm:$0xff] %v361_v57 }
 0x214   :  { %534 = vst [vmem:[%s915_s6 + $0x20] sm:$0xff] %v362_v58  ;;  %536 = vst [vmem:[%s915_s6 + $0x28] sm:$0xff] %v363_v59  ;;  %v371_v3 = vadd.f32 %v325_v52, %v267_v53 }
 0x215   :  { %420 = vst [vmem:[#allocation9 + $0x30] sm:$0xf] %v364_v60  ;;  %540 = vst [vmem:[%s915_s6 + $0x38] sm:$0xff] %v365_v61 }
 0x216   :  { %542 = vst [vmem:[%s915_s6 + $0x40] sm:$0xff] %v366_v62  ;;  %544 = vst [vmem:[%s915_s6 + $0x48] sm:$0xff] %v367_v63 }
 0x217   :  { %546 = vst [vmem:[%s915_s6 + $0x50] sm:$0xff] %v368_v0  ;;  %548 = vst [vmem:[%s915_s6 + $0x58] sm:$0xff] %v369_v1 }
 0x218   :  { %550 = vst [vmem:[%s915_s6 + $0x60] sm:$0xff] %v370_v2  ;;  %427 = vst [vmem:[#allocation9 + $0x68] sm:$0xf] %v371_v3 }
 0x21c   :  { %v537_v4 = vld [vmem:[#allocation9 + $0x30] sm:$0xff] }
 0x21d   :  { %538 = vst [vmem:[%s915_s6 + $0x30] sm:$0xff] %v537_v4 }
 0x21f   :  { %v551_v5 = vld [vmem:[#allocation9 + $0x68] sm:$0xff] }
 0x220   :  { %552 = vst [vmem:[%s915_s6 + $0x68] sm:$0xff] %v551_v5 }
 0x221   :  { %558 = vsyncpa [#allocation3], 1 }
 0x222   :  { %559 = vsyncpa [#allocation5], 1 }
 0x223   :  { %560 = vsyncpa [#allocation8], 1 }

</bundles_post_ra>
